<compile_context>
chip_gen: v5e
topology: v5e:2x2
jax: 0.10.0
libtpu: 0.0.40
codegen_flags: <defaults>
</compile_context>

<pallas_src>
import jax
import jax.numpy as jnp
from jax.experimental import pallas as pl
from jax.experimental.pallas import tpu as pltpu


_LANES = 128                       # vreg lane width
_MAX_TILE_ROWS = 4096              # (4096, 128) f32 block = 2 MiB
_MIN_TILE_ROWS = 512               # don't split below this just to get >= 2 steps
_VMEM_LIMIT_BYTES = 32 * 1024 * 1024


def _affine_kernel(wb_ref, x_ref, o_ref):
    # wb_ref: SMEM (2,) = [weight, bias]; x_ref / o_ref: VMEM (tile_rows, 128).
    # One VPU fused multiply-add per vreg; the kernel is DMA-bound.
    o_ref[...] = x_ref[...] * wb_ref[0] + wb_ref[1]


def _tile_rows_for(rows, itemsize):
    """Row-tile choice: <=2 MiB blocks, sublane-aligned, and >=2 grid steps
    when there is enough work for both v7x TensorCores."""
    sublane = max(8, 32 // itemsize)          # 8 (f32) / 16 (bf16) / 32 (int8)
    if rows <= sublane:
        return rows                            # single block == full dim (always legal)
    tile = min(_MAX_TILE_ROWS, max(_MIN_TILE_ROWS, pl.cdiv(rows, 2)))
    tile = min(tile, rows)
    return max(sublane, (tile // sublane) * sublane)


def _affine_pallas(x2d, wb):
    """Elementwise w*x + b on a lane-dense (rows, 128) slab."""
    rows = x2d.shape[0]
    tile_rows = _tile_rows_for(rows, x2d.dtype.itemsize)
    grid = (pl.cdiv(rows, tile_rows),)         # ragged last block handled by Pallas
    return pl.pallas_call(
        _affine_kernel,
        out_shape=jax.ShapeDtypeStruct(x2d.shape, x2d.dtype),
        grid=grid,
        in_specs=[
            pl.BlockSpec(memory_space=pltpu.SMEM),                 # packed [w, b]
            pl.BlockSpec((tile_rows, _LANES), lambda i: (i, 0)),   # x tile
        ],
        out_specs=pl.BlockSpec((tile_rows, _LANES), lambda i: (i, 0)),
        compiler_params=pltpu.CompilerParams(
            dimension_semantics=("parallel",),   # batch axis -> megacore on v7x
            vmem_limit_bytes=_VMEM_LIMIT_BYTES,
        ),
    )(wb, x2d)


def simple_recommender_forward(x, weight, bias):
    """x: (B, 1), weight: (1, 1), bias: (1,) -> (B, 1).  Matches nn.Linear(1, 1)."""
    orig_shape = x.shape
    dtype = x.dtype
    n = x.size                         # B * in_features, in_features == 1 (static)

    wb = jnp.concatenate([jnp.ravel(weight), jnp.ravel(bias)])
    if wb.dtype != dtype:
        wb = wb.astype(dtype)

    x_flat = x.reshape(-1)             # contiguous -> free bitcast under jit
    n_bulk = (n // _LANES) * _LANES    # largest 128-aligned prefix

    if n_bulk == n:
        # Common case: fully copy-free.  No pad, no slice, only bitcast reshapes.
        y2d = _affine_pallas(x_flat.reshape(n // _LANES, _LANES), wb)
        return y2d.reshape(orig_shape)

    # Ragged case: 128-aligned bulk through Pallas, <128-element tail via a tiny
    # plain-JAX fused multiply-add (cheaper than a padded-copy + slice of the slab).
    parts = []
    if n_bulk > 0:
        y2d = _affine_pallas(x_flat[:n_bulk].reshape(n_bulk // _LANES, _LANES), wb)
        parts.append(y2d.reshape(-1))
    parts.append(x_flat[n_bulk:] * wb[0] + wb[1])
    return jnp.concatenate(parts).reshape(orig_shape)


if __name__ == "__main__":
    key = jax.random.PRNGKey(0)
    kw, kb, k1, k2, k3 = jax.random.split(key, 5)

    # nn.Linear(1, 1) parameters: weight (out_features=1, in_features=1), bias (1,).
    weight = jax.random.uniform(kw, (1, 1), dtype=jnp.float32, minval=-1.0, maxval=1.0)
    bias = jax.random.uniform(kb, (1,), dtype=jnp.float32, minval=-1.0, maxval=1.0)

    fwd = jax.jit(simple_recommender_forward)

    def check(batch, k):
        x = jax.random.normal(k, (batch, 1), dtype=jnp.float32)
        y = jax.block_until_ready(fwd(x, weight, bias))
        y_ref = x @ weight.T + bias
        assert y.shape == (batch, 1), f"bad shape at batch={batch}"
        assert jnp.allclose(y, y_ref, atol=1e-6, rtol=1e-6), f"mismatch at batch={batch}"

    check(2048, k1)     # divisible: copy-free single-tile path
    check(131072, k2)   # divisible: multi-tile grid (>=2 parallel steps, megacore-splittable)
    check(1000, k3)     # ragged: 896-element Pallas bulk + 104-element plain-JAX tail

    print("KERNEL_OK")
</pallas_src>

<mosaic_0001>
module attributes {stable_mosaic.version = 11 : i64} {
  func.func @_affine_kernel(%arg0: i32, %arg1: memref<2xf32, #tpu.memory_space<smem>>, %arg2: memref<16x128xf32, #tpu.memory_space<vmem>>, %arg3: memref<16x128xf32, #tpu.memory_space<vmem>>) attributes {dimension_semantics = [#tpu.dimension_semantics<parallel>], iteration_bounds = array<i64: 1>, scalar_prefetch = 0 : i64, scratch_operands = 0 : i64, tpu.core_type = #tpu.core_type<tc>, window_params = [{transform_indices = @transform_0, window_bounds = array<i64: 2>}, {transform_indices = @transform_1, window_bounds = array<i64: 16, 128>}, {transform_indices = @transform_2, window_bounds = array<i64: 16, 128>}]} {
    %c0 = arith.constant 0 : index
    %c0_0 = arith.constant 0 : index
    %0 = vector.load %arg2[%c0, %c0_0] : memref<16x128xf32, #tpu.memory_space<vmem>>, vector<16x128xf32>
    %c0_1 = arith.constant 0 : index
    %1 = memref.load %arg1[%c0_1] : memref<2xf32, #tpu.memory_space<smem>>
    %2 = vector.broadcast %1 : f32 to vector<16x128xf32>
    %3 = arith.mulf %0, %2 : vector<16x128xf32>
    %c1 = arith.constant 1 : index
    %4 = memref.load %arg1[%c1] : memref<2xf32, #tpu.memory_space<smem>>
    %5 = vector.broadcast %4 : f32 to vector<16x128xf32>
    %6 = arith.addf %3, %5 : vector<16x128xf32>
    %c0_2 = arith.constant 0 : index
    %c0_3 = arith.constant 0 : index
    %7 = vector.load %arg3[%c0_2, %c0_3] : memref<16x128xf32, #tpu.memory_space<vmem>>, vector<16x128xf32>
    tpu.vector_store %arg3[%c0_2, %c0_3], %6 {strides = array<i32>} : memref<16x128xf32, #tpu.memory_space<vmem>>, vector<16x128xf32>,
    return
  }
  func.func @transform_0(%arg0: i32) -> i32 {
    %c0_i32 = arith.constant 0 : i32
    %c0_i32_0 = arith.constant 0 : i32
    return %c0_i32 : i32
  }
  func.func @transform_1(%arg0: i32) -> (i32, i32) {
    %c0_i32 = arith.constant 0 : i32
    %c0_i32_0 = arith.constant 0 : i32
    return %arg0, %c0_i32 : i32, i32
  }
  func.func @transform_2(%arg0: i32) -> (i32, i32) {
    %c0_i32 = arith.constant 0 : i32
    %c0_i32_0 = arith.constant 0 : i32
    return %arg0, %c0_i32 : i32, i32
  }
}

</mosaic_0001>

<bundles_post_ra>
// kernel: simple_recommender_forward.1
= control target key start
LH: loop header
LB: loop body
LE: loop exit
PB: predicated region body
PF: predicated region fallthrough
CT: control target
= control target key end

     0   :  { %7 = vsyncpa [#allocation5], 0  ;;  %s174_s0 = inlined_call_operand.vmem [shape: f32[2], index: 0, kind: input, shape index: {}]   ;;  %s175_s1 = inlined_call_operand.hbm [shape: f32[16,128], index: 1, kind: input, shape index: {}]   ;;  %s176_s2 = inlined_call_operand.hbm [shape: f32[16,128], index: 2, kind: output, shape index: {}]  }
   0x1   :  { %8 = vsyncpa [#allocation3], 0 }
   0x2   :  { %9 = vsyncpa [#allocation4], 0  ;;  %s15_s11 = sshll.u32 %s174_s0, 4  ;;  %s23_s14 = sshll.u32 %s175_s1, 4  ;;  %s16_s11 = int_to_ptr.vmem [resolvable:$true] %s15_s11  ;;  %s24_s14 = int_to_ptr.hbm [resolvable:$true] %s23_s14 }
   0x3   :  { %s145_s15 = smov [#allocation2]   ;;  %s146_s16 = smov [#allocation6]  }
   0x4   :  { %18 = dma.vmem_to_smem %s16_s11, 16, %s145_s15, [#allocation5]  }
   0x5   :  { %s25_s17 = sshll.u32 %s146_s16, 4  ;;  %s147_s18 = smov 128   ;;  %s26_s17 = int_to_ptr.vmem [resolvable:$true] %s25_s17 }
   0x6   :  { %s148_s19 = smov 8  }
   0x7   :  { %31 = dma.hbm_to_vmem [thread:$0]  %s24_s14, 256, %s26_s17, [#allocation3], %s147_s18, %s147_s18, %s148_s19  }
   0x8   :  { %139 = dma.done.wait [#allocation5], 16  }
   0x9   :  { %140 = vsyncadd [#allocation5], 4294967280 }
   0xa   :  { %141 = dma.done.wait [#allocation3], 256  }
   0xb   :  { %142 = vsyncadd [#allocation3], 4294967040 }
   0xc   :  { %40 = sfence }
   0xd   :  { %s43_s0 = sld [smem:[#allocation2]]  ;;  %v41_v0 = vld [vmem:[#allocation6] sm:$0xff]  ;;  %v42_v1 = vld [vmem:[#allocation6 + $0x8] sm:$0xff]  ;;  %s149_s1 = smov [#allocation7]  }
   0xe   :  { %s73_s20 = sld [smem:[#allocation2 + $0x1]]  ;;  %s57_s21 = sshll.u32 %s149_s1, 4  ;;  %s58_s21 = int_to_ptr.vmem [resolvable:$true] %s57_s21 }
   0xf   :  { %s59_s24 = sshll.u32 %s176_s2, 4  ;;  %s60_s24 = int_to_ptr.hbm [resolvable:$true] %s59_s24 }
  0x13   :  { %v44_v2 = vstv %s43_s0 }
  0x14   :  { %v45_v3 = vmul.f32 %v44_v2, %v41_v0  ;;  %v48_v4 = vstv %s73_s20  ;;  %v46_v5 = vmul.f32 %v44_v2, %v42_v1 }
  0x16   :  { %v49_v6 = vadd.f32 %v48_v4, %v45_v3  ;;  %v50_v7 = vadd.f32 %v48_v4, %v46_v5 }
  0x18   :  { %51 = vst [vmem:[#allocation7] sm:$0xff] %v49_v6 }
  0x19   :  { %52 = vst [vmem:[#allocation7 + $0x8] sm:$0xff] %v50_v7 }
  0x1a   :  { %65 = dma.vmem_to_hbm [thread:$0]  %s58_s21, 256, %s60_s24, [#allocation4], %s147_s18, %s147_s18, %s148_s19  }
  0x1b   :  { %143 = dma.done.wait [#allocation4], 256  }
  0x1c   :  { %144 = vsyncadd [#allocation4], 4294967040 }
  0x1d   :  { %70 = vsyncpa [#allocation3], 1 }
  0x1e   :  { %71 = vsyncpa [#allocation4], 1 }
  0x1f   :  { %72 = vsyncpa [#allocation5], 1 }

</bundles_post_ra>
